<compile_context>
chip_gen: v6e
topology: v6e:2x2x1
jax: 0.10.0
libtpu: 0.0.40
codegen_flags: <defaults>
</compile_context>

<pallas_src>
import jax
import jax.numpy as jnp
from jax.experimental import pallas as pl
from jax.experimental.pallas import tpu as pltpu

LANE = 128
SUBLANE = 8


def _round_up(x, m):
    return ((x + m - 1) // m) * m


# ----------------------------------------------------------------------------
# Fused MLP kernel: all layers in one body, batch-tiled by the grid.
# Refs: (x_ref, w0, b0, w1, b1, ..., o_ref).  Weights are bf16, biases f32.
# ----------------------------------------------------------------------------
def _make_mlp_kernel(num_linear):
    def kernel(x_ref, *refs):
        o_ref = refs[-1]
        wb = refs[:-1]

        h = x_ref[...]                                   # bf16 (TB, D0p)
        for i in range(num_linear):
            w = wb[2 * i][...]                           # bf16 (D_i, D_{i+1})
            b = wb[2 * i + 1][...]                       # f32  (1,  D_{i+1})
            acc = jnp.dot(h, w, preferred_element_type=jnp.float32) + b
            if i < num_linear - 1:
                acc = jnp.maximum(acc, 0.0)              # ReLU (Dropout = identity, eval)
                h = acc.astype(jnp.bfloat16)             # bf16 operands for next MXU push
            else:
                o_ref[...] = acc.astype(o_ref.dtype)

    return kernel


# ----------------------------------------------------------------------------
# Wrapper: lane-pads every feature dim, sublane-pads the batch, one pallas_call.
# ----------------------------------------------------------------------------
@jax.jit
def mlp_forward(x, params):
    """x: (batch, input_dim) -> logits: (batch, output_dim).

    params: list of (W, b) with W: (in_dim, out_dim) (transposed vs PyTorch),
            b: (1, out_dim).
    """
    x = x.astype(jnp.float32)
    B, D_in = x.shape
    num_linear = len(params)
    out_dim = params[-1][0].shape[1]

    # Lane-pad every feature dim to a multiple of 128.
    dims = [D_in] + [w.shape[1] for (w, _) in params]
    pdims = [_round_up(d, LANE) for d in dims]

    padded_params = []
    for i, (w, b) in enumerate(params):
        di, do = w.shape
        pdi, pdo = pdims[i], pdims[i + 1]
        w_p = jnp.pad(w, ((0, pdi - di), (0, pdo - do))).astype(jnp.bfloat16)
        b_p = jnp.pad(b.reshape(1, do), ((0, 0), (0, pdo - do))).astype(jnp.float32)
        padded_params.append((w_p, b_p))

    # Batch tile: sublane-aligned, up to 512 rows (Mosaic splits M>128 across
    # MXU pushes automatically; big tiles amortize per-step overhead).
    tb = min(512, _round_up(B, SUBLANE))
    padded_b = _round_up(B, tb)

    x_p = jnp.pad(x, ((0, padded_b - B), (0, pdims[0] - D_in))).astype(jnp.bfloat16)

    grid = (padded_b // tb,)

    in_specs = [pl.BlockSpec((tb, pdims[0]), lambda i: (i, 0))]
    flat_wb = []
    for (w_p, b_p) in padded_params:
        # Constant index_map -> single buffer: no point double-buffering weights.
        in_specs.append(pl.BlockSpec(w_p.shape, lambda i: (0, 0),
                                     pipeline_mode=pl.Buffered(1)))
        in_specs.append(pl.BlockSpec(b_p.shape, lambda i: (0, 0),
                                     pipeline_mode=pl.Buffered(1)))
        flat_wb.extend([w_p, b_p])

    out_specs = pl.BlockSpec((tb, pdims[-1]), lambda i: (i, 0))

    # Explicit VMEM budget: bf16 weights (1 buffer each) + f32 biases +
    # double-buffered activation/output tiles, with 2x headroom; 64 MiB cap (v7x).
    weight_bytes = sum(int(w.size) * 2 + int(b.size) * 4 for (w, b) in padded_params)
    max_dim = max(pdims)
    act_bytes = 2 * tb * max_dim * 2 + 2 * tb * pdims[-1] * 4
    vmem_limit = int(min(max(2 * (weight_bytes + act_bytes), 16 << 20), 64 << 20))

    flops = 2 * padded_b * sum(pdims[i] * pdims[i + 1] for i in range(num_linear))
    bytes_accessed = int(x_p.size * 2 + weight_bytes + padded_b * pdims[-1] * 4)

    y = pl.pallas_call(
        _make_mlp_kernel(num_linear),
        out_shape=jax.ShapeDtypeStruct((padded_b, pdims[-1]), jnp.float32),
        grid=grid,
        in_specs=in_specs,
        out_specs=out_specs,
        compiler_params=pltpu.CompilerParams(
            dimension_semantics=("parallel",),
            vmem_limit_bytes=vmem_limit),
        cost_estimate=pl.CostEstimate(
            flops=flops, transcendentals=0, bytes_accessed=bytes_accessed),
    )(x_p, *flat_wb)

    return y[:B, :out_dim]


# ----------------------------------------------------------------------------
# Parameter construction (PyTorch nn.Linear-style uniform init, deterministic)
# ----------------------------------------------------------------------------
def init_mlp_params(key, input_dim, hidden_dims, output_dim):
    dims = [input_dim] + list(hidden_dims) + [output_dim]
    params = []
    for i in range(len(dims) - 1):
        fan_in, fan_out = dims[i], dims[i + 1]
        bound = 1.0 / jnp.sqrt(jnp.float32(fan_in))
        key, kw, kb = jax.random.split(key, 3)
        w = jax.random.uniform(kw, (fan_in, fan_out), jnp.float32, -bound, bound)
        b = jax.random.uniform(kb, (1, fan_out), jnp.float32, -bound, bound)
        params.append((w, b))
    return params


# ----------------------------------------------------------------------------
# Pure-JAX f32 reference (same math, outside Pallas) for correctness check.
# ----------------------------------------------------------------------------
def mlp_reference(x, params):
    h = x.astype(jnp.float32)
    n = len(params)
    for i, (w, b) in enumerate(params):
        h = h @ w + b
        if i < n - 1:
            h = jnp.maximum(h, 0.0)
    return h


# ----------------------------------------------------------------------------
# Demo
# ----------------------------------------------------------------------------
if __name__ == "__main__":
    batch = 2
    input_dim = 64
    hidden_dims = (128, 64)
    output_dim = 6

    key = jax.random.PRNGKey(0)
    key, xk = jax.random.split(key)
    x = jax.random.normal(xk, (batch, input_dim), dtype=jnp.float32)

    params = init_mlp_params(key, input_dim, hidden_dims, output_dim)

    logits = mlp_forward(x, params)
    jax.block_until_ready(logits)

    ref = mlp_reference(x, params)
    assert logits.shape == (batch, output_dim)
    assert logits.dtype == jnp.float32
    # bf16 MXU operands with f32 accumulation -> relaxed tolerance vs f32 reference.
    assert jnp.allclose(logits, ref, rtol=2e-2, atol=2e-2), (
        f"max abs err {jnp.max(jnp.abs(logits - ref))}")
    print("KERNEL_OK")
</pallas_src>

<mosaic_0001>
module attributes {stable_mosaic.version = 11 : i64} {
  func.func @kernel(%arg0: i32, %arg1: memref<8x128xbf16, #tpu.memory_space<vmem>>, %arg2: memref<128x128xbf16, #tpu.memory_space<vmem>>, %arg3: memref<1x128xf32, #tpu.memory_space<vmem>>, %arg4: memref<128x128xbf16, #tpu.memory_space<vmem>>, %arg5: memref<1x128xf32, #tpu.memory_space<vmem>>, %arg6: memref<128x128xbf16, #tpu.memory_space<vmem>>, %arg7: memref<1x128xf32, #tpu.memory_space<vmem>>, %arg8: memref<8x128xf32, #tpu.memory_space<vmem>>) attributes {dimension_semantics = [#tpu.dimension_semantics<parallel>], iteration_bounds = array<i64: 1>, scalar_prefetch = 0 : i64, scratch_operands = 0 : i64, tpu.core_type = #tpu.core_type<tc>, window_params = [{transform_indices = @transform_0, window_bounds = array<i64: 8, 128>}, {pipeline_mode = #tpu.pipeline_mode<synchronous>, transform_indices = @transform_1, window_bounds = array<i64: 128, 128>}, {pipeline_mode = #tpu.pipeline_mode<synchronous>, transform_indices = @transform_2, window_bounds = array<i64: 1, 128>}, {pipeline_mode = #tpu.pipeline_mode<synchronous>, transform_indices = @transform_3, window_bounds = array<i64: 128, 128>}, {pipeline_mode = #tpu.pipeline_mode<synchronous>, transform_indices = @transform_4, window_bounds = array<i64: 1, 128>}, {pipeline_mode = #tpu.pipeline_mode<synchronous>, transform_indices = @transform_5, window_bounds = array<i64: 128, 128>}, {pipeline_mode = #tpu.pipeline_mode<synchronous>, transform_indices = @transform_6, window_bounds = array<i64: 1, 128>}, {transform_indices = @transform_7, window_bounds = array<i64: 8, 128>}]} {
    %c0 = arith.constant 0 : index
    %c0_0 = arith.constant 0 : index
    %0 = vector.load %arg1[%c0, %c0_0] : memref<8x128xbf16, #tpu.memory_space<vmem>>, vector<8x128xbf16>
    %c0_1 = arith.constant 0 : index
    %c0_2 = arith.constant 0 : index
    %1 = vector.load %arg2[%c0_1, %c0_2] : memref<128x128xbf16, #tpu.memory_space<vmem>>, vector<128x128xbf16>
    %c0_3 = arith.constant 0 : index
    %c0_4 = arith.constant 0 : index
    %2 = vector.load %arg3[%c0_3, %c0_4] : memref<1x128xf32, #tpu.memory_space<vmem>>, vector<1x128xf32>
    %cst = arith.constant dense<0.000000e+00> : vector<8x128xf32>
    %3 = tpu.matmul %0, %1, %cst {dimension_numbers = #tpu.dot_dimension_numbers<[1], [0], [0], [1], [0, 0, 1, 1], [], []>} : vector<8x128xbf16>, vector<128x128xbf16>, vector<8x128xf32> -> vector<8x128xf32>
    %4 = vector.broadcast %2 : vector<1x128xf32> to vector<8x128xf32>
    %5 = arith.addf %3, %4 : vector<8x128xf32>
    %cst_5 = arith.constant 0.000000e+00 : f32
    %6 = vector.broadcast %cst_5 : f32 to vector<8x128xf32>
    %7 = arith.maximumf %5, %6 : vector<8x128xf32>
    %8 = arith.truncf %7 : vector<8x128xf32> to vector<8x128xbf16>
    %c0_6 = arith.constant 0 : index
    %c0_7 = arith.constant 0 : index
    %9 = vector.load %arg4[%c0_6, %c0_7] : memref<128x128xbf16, #tpu.memory_space<vmem>>, vector<128x128xbf16>
    %c0_8 = arith.constant 0 : index
    %c0_9 = arith.constant 0 : index
    %10 = vector.load %arg5[%c0_8, %c0_9] : memref<1x128xf32, #tpu.memory_space<vmem>>, vector<1x128xf32>
    %cst_10 = arith.constant dense<0.000000e+00> : vector<8x128xf32>
    %11 = tpu.matmul %8, %9, %cst_10 {dimension_numbers = #tpu.dot_dimension_numbers<[1], [0], [0], [1], [0, 0, 1, 1], [], []>} : vector<8x128xbf16>, vector<128x128xbf16>, vector<8x128xf32> -> vector<8x128xf32>
    %12 = vector.broadcast %10 : vector<1x128xf32> to vector<8x128xf32>
    %13 = arith.addf %11, %12 : vector<8x128xf32>
    %cst_11 = arith.constant 0.000000e+00 : f32
    %14 = vector.broadcast %cst_11 : f32 to vector<8x128xf32>
    %15 = arith.maximumf %13, %14 : vector<8x128xf32>
    %16 = arith.truncf %15 : vector<8x128xf32> to vector<8x128xbf16>
    %c0_12 = arith.constant 0 : index
    %c0_13 = arith.constant 0 : index
    %17 = vector.load %arg6[%c0_12, %c0_13] : memref<128x128xbf16, #tpu.memory_space<vmem>>, vector<128x128xbf16>
    %c0_14 = arith.constant 0 : index
    %c0_15 = arith.constant 0 : index
    %18 = vector.load %arg7[%c0_14, %c0_15] : memref<1x128xf32, #tpu.memory_space<vmem>>, vector<1x128xf32>
    %cst_16 = arith.constant dense<0.000000e+00> : vector<8x128xf32>
    %19 = tpu.matmul %16, %17, %cst_16 {dimension_numbers = #tpu.dot_dimension_numbers<[1], [0], [0], [1], [0, 0, 1, 1], [], []>} : vector<8x128xbf16>, vector<128x128xbf16>, vector<8x128xf32> -> vector<8x128xf32>
    %20 = vector.broadcast %18 : vector<1x128xf32> to vector<8x128xf32>
    %21 = arith.addf %19, %20 : vector<8x128xf32>
    %c0_17 = arith.constant 0 : index
    %c0_18 = arith.constant 0 : index
    %22 = vector.load %arg8[%c0_17, %c0_18] : memref<8x128xf32, #tpu.memory_space<vmem>>, vector<8x128xf32>
    tpu.vector_store %arg8[%c0_17, %c0_18], %21 {strides = array<i32>} : memref<8x128xf32, #tpu.memory_space<vmem>>, vector<8x128xf32>,
    return
  }
  func.func @transform_0(%arg0: i32) -> (i32, i32) {
    %c0_i32 = arith.constant 0 : i32
    %c0_i32_0 = arith.constant 0 : i32
    return %arg0, %c0_i32 : i32, i32
  }
  func.func @transform_1(%arg0: i32) -> (i32, i32) {
    %c0_i32 = arith.constant 0 : i32
    %c0_i32_0 = arith.constant 0 : i32
    %c0_i32_1 = arith.constant 0 : i32
    return %c0_i32, %c0_i32_0 : i32, i32
  }
  func.func @transform_2(%arg0: i32) -> (i32, i32) {
    %c0_i32 = arith.constant 0 : i32
    %c0_i32_0 = arith.constant 0 : i32
    %c0_i32_1 = arith.constant 0 : i32
    return %c0_i32, %c0_i32_0 : i32, i32
  }
  func.func @transform_3(%arg0: i32) -> (i32, i32) {
    %c0_i32 = arith.constant 0 : i32
    %c0_i32_0 = arith.constant 0 : i32
    %c0_i32_1 = arith.constant 0 : i32
    return %c0_i32, %c0_i32_0 : i32, i32
  }
  func.func @transform_4(%arg0: i32) -> (i32, i32) {
    %c0_i32 = arith.constant 0 : i32
    %c0_i32_0 = arith.constant 0 : i32
    %c0_i32_1 = arith.constant 0 : i32
    return %c0_i32, %c0_i32_0 : i32, i32
  }
  func.func @transform_5(%arg0: i32) -> (i32, i32) {
    %c0_i32 = arith.constant 0 : i32
    %c0_i32_0 = arith.constant 0 : i32
    %c0_i32_1 = arith.constant 0 : i32
    return %c0_i32, %c0_i32_0 : i32, i32
  }
  func.func @transform_6(%arg0: i32) -> (i32, i32) {
    %c0_i32 = arith.constant 0 : i32
    %c0_i32_0 = arith.constant 0 : i32
    %c0_i32_1 = arith.constant 0 : i32
    return %c0_i32, %c0_i32_0 : i32, i32
  }
  func.func @transform_7(%arg0: i32) -> (i32, i32) {
    %c0_i32 = arith.constant 0 : i32
    %c0_i32_0 = arith.constant 0 : i32
    return %arg0, %c0_i32 : i32, i32
  }
}

</mosaic_0001>

<bundles_post_ra>
// kernel: mlp_forward.1
= control target key start
LH: loop header
LB: loop body
LE: loop exit
PB: predicated region body
PF: predicated region fallthrough
CT: control target
= control target key end

     0   :  { %v510_v0 = vmov 0.0   ;;  %vm511_vm0 = vmmov 0   ;;  %s669_s1 = inlined_call_operand.vmem [shape: bf16[128,128], index: 1, kind: input, shape index: {}]   ;;  %s670_s3 = inlined_call_operand.vmem [shape: bf16[128,128], index: 3, kind: input, shape index: {}]   ;;  %s671_s0 = inlined_call_operand.vmem [shape: bf16[8,128], index: 0, kind: input, shape index: {}]   ;;  %s672_s5 = inlined_call_operand.vmem [shape: bf16[128,128], index: 5, kind: input, shape index: {}]   ;;  %s673_s2 = inlined_call_operand.vmem [shape: f32[1,128], index: 2, kind: input, shape index: {}]   ;;  %s674_s4 = inlined_call_operand.vmem [shape: f32[1,128], index: 4, kind: input, shape index: {}]   ;;  %s675_s6 = inlined_call_operand.vmem [shape: f32[1,128], index: 6, kind: input, shape index: {}]   ;;  %s676_s7 = inlined_call_operand.vmem [shape: f32[8,128], index: 7, kind: output, shape index: {}]  }
   0x1   :  { %424 = vmatprep.subr.bf16.mxu0 %v510_v0  ;;  %v486_v1 = vld [vmem:[%s669_s1 + $0x38] sm:$0xff]   ;;  %440 = vmatprep.mubr.msk.bf16.mxu0 %vm511_vm0, %v510_v0  ;;  %v487_v2 = vld [vmem:[%s669_s1 + $0x30] sm:$0xff]   ;;  %v488_v3 = vld [vmem:[%s669_s1 + $0x28] sm:$0xff]  }
   0x2   :  { %444 = vmatprep.subr.bf16.mxu1 %v510_v0  ;;  %460 = vmatprep.mubr.msk.bf16.mxu1 %vm511_vm0, %v510_v0  ;;  %v494_v4 = vld [vmem:[%s670_s3 + $0x38] sm:$0xff]   ;;  %v489_v5 = vld [vmem:[%s669_s1 + $0x20] sm:$0xff]   ;;  %v495_v6 = vld [vmem:[%s670_s3 + $0x30] sm:$0xff]  }
   0x3   :  { %425 = vmatpush3.bf16.msra.mxu0 %v486_v1  ;;  %445 = vmatpush3.bf16.msra.mxu1 %v494_v4  ;;  %v490_v7 = vld [vmem:[%s669_s1 + $0x18] sm:$0xff]   ;;  %v496_v8 = vld [vmem:[%s670_s3 + $0x28] sm:$0xff]   ;;  %v491_v9 = vld [vmem:[%s669_s1 + $0x10] sm:$0xff]  }
   0x4   :  { %426 = vmatprep.subr.bf16.mxu0 %v510_v0  ;;  %446 = vmatprep.subr.bf16.mxu1 %v510_v0  ;;  %v497_v10 = vld [vmem:[%s670_s3 + $0x20] sm:$0xff]   ;;  %v492_v11 = vld [vmem:[%s669_s1 + $0x8] sm:$0xff]   ;;  %v498_v12 = vld [vmem:[%s670_s3 + $0x18] sm:$0xff]  }
   0x5   :  { %v493_v13 = vld [vmem:[%s669_s1] sm:$0xff]   ;;  %v499_v14 = vld [vmem:[%s670_s3 + $0x10] sm:$0xff]   ;;  %v500_v16 = vld [vmem:[%s670_s3 + $0x8] sm:$0xff]  }
   0x6   :  { %v27_v15 = vld [vmem:[%s671_s0] sm:$0xf]  ;;  %v502_v18 = vld [vmem:[%s672_s5 + $0x38] sm:$0xff]   ;;  %v503_v19 = vld [vmem:[%s672_s5 + $0x30] sm:$0xff]  }
   0x7   :  { %427 = vmatpush3.bf16.msra.mxu0 %v487_v2  ;;  %447 = vmatpush3.bf16.msra.mxu1 %v495_v6  ;;  %v501_v17 = vld [vmem:[%s670_s3] sm:$0xff]   ;;  %v504_v20 = vld [vmem:[%s672_s5 + $0x28] sm:$0xff]   ;;  %v506_v22 = vld [vmem:[%s672_s5 + $0x18] sm:$0xff]  }
   0x8   :  { %428 = vmatprep.subr.bf16.mxu0 %v510_v0  ;;  %448 = vmatprep.subr.bf16.mxu1 %v510_v0  ;;  %v505_v21 = vld [vmem:[%s672_s5 + $0x20] sm:$0xff]   ;;  %v507_v23 = vld [vmem:[%s672_s5 + $0x10] sm:$0xff]   ;;  %v508_v32 = vld [vmem:[%s672_s5 + $0x8] sm:$0xff]  }
   0x9   :  { %v370_v24 = vld [vmem:[%s673_s2] ss:$0 sm:$0xff] }
   0xa   :  { %v509_v33 = vld [vmem:[%s672_s5] sm:$0xff]  }
   0xb   :  { %429 = vmatpush3.bf16.msra.mxu0 %v488_v3  ;;  %449 = vmatpush3.bf16.msra.mxu1 %v496_v8  ;;  %v379_v34 = vld [vmem:[%s674_s4] ss:$0 sm:$0xff] }
   0xc   :  { %430 = vmatprep.subr.bf16.mxu0 %v510_v0  ;;  %450 = vmatprep.subr.bf16.mxu1 %v510_v0  ;;  %v388_v42 = vld [vmem:[%s675_s6] ss:$0 sm:$0xff] }
   0xf   :  { %431 = vmatpush3.bf16.msra.mxu0 %v489_v5  ;;  %451 = vmatpush3.bf16.msra.mxu1 %v497_v10 }
  0x10   :  { %432 = vmatprep.subr.bf16.mxu0 %v510_v0  ;;  %452 = vmatprep.subr.bf16.mxu1 %v510_v0 }
  0x13   :  { %433 = vmatpush3.bf16.msra.mxu0 %v490_v7  ;;  %453 = vmatpush3.bf16.msra.mxu1 %v498_v12 }
  0x14   :  { %434 = vmatprep.subr.bf16.mxu0 %v510_v0  ;;  %454 = vmatprep.subr.bf16.mxu1 %v510_v0 }
  0x17   :  { %435 = vmatpush3.bf16.msra.mxu0 %v491_v9  ;;  %455 = vmatpush3.bf16.msra.mxu1 %v499_v14 }
  0x18   :  { %436 = vmatprep.subr.bf16.mxu0 %v510_v0  ;;  %456 = vmatprep.subr.bf16.mxu1 %v510_v0 }
  0x1b   :  { %437 = vmatpush3.bf16.msra.mxu0 %v492_v11  ;;  %457 = vmatpush3.bf16.msra.mxu1 %v500_v16 }
  0x1c   :  { %438 = vmatprep.subr.bf16.mxu0 %v510_v0  ;;  %458 = vmatprep.subr.bf16.mxu1 %v510_v0 }
  0x1f   :  { %439 = vmatpush3.bf16.msra.mxu0 %v493_v13  ;;  %459 = vmatpush3.bf16.msra.mxu1 %v501_v17 }
  0x20   :  { %464 = vmatprep.subr.bf16.mxu0 %v510_v0 }
  0x22   :  { %441 = vmatmul.mubr.bf16.vlgmr.msra.gmra.mxu0 %v27_v15 }
  0x23   :  { %480 = vmatprep.mubr.msk.bf16.mxu0 %vm511_vm0, %v510_v0  ;;  %465 = vmatpush3.bf16.msra.mxu0 %v502_v18 }
  0x24   :  { %466 = vmatprep.subr.bf16.mxu0 %v510_v0 }
  0x27   :  { %467 = vmatpush3.bf16.msra.mxu0 %v503_v19 }
  0x28   :  { %468 = vmatprep.subr.bf16.mxu0 %v510_v0 }
  0x2b   :  { %469 = vmatpush3.bf16.msra.mxu0 %v504_v20 }
  0x2c   :  { %470 = vmatprep.subr.bf16.mxu0 %v510_v0 }
  0x2f   :  { %471 = vmatpush3.bf16.msra.mxu0 %v505_v21 }
  0x30   :  { %472 = vmatprep.subr.bf16.mxu0 %v510_v0 }
  0x33   :  { %473 = vmatpush3.bf16.msra.mxu0 %v506_v22 }
  0x34   :  { %474 = vmatprep.subr.bf16.mxu0 %v510_v0 }
  0x37   :  { %475 = vmatpush3.bf16.msra.mxu0 %v507_v23 }
  0x38   :  { %476 = vmatprep.subr.bf16.mxu0 %v510_v0 }
  0x3b   :  { %477 = vmatpush3.bf16.msra.mxu0 %v508_v32 }
  0x3c   :  { %478 = vmatprep.subr.bf16.mxu0 %v510_v0 }
  0x3f   :  { %479 = vmatpush3.bf16.msra.mxu0 %v509_v33 }
  0xe2   :  { %v133_v25 = vpop.f32.mrf.mxu0 }
  0xe3   :  { %v134_v26 = vadd.f32 %v370_v24, %v133_v25 }
  0xe4   :  { %v442_v27 = vpop.f32.mrf.mxu0 }
  0xe5   :  { %v139_v28 = vmax.f32 %v134_v26, 0.0 }
  0xe6   :  { %v136_v29 = vpop.f32.mrf.mxu0 }
  0xe7   :  { %v140_v30 = vpack.c.bf16 %v139_v28, %v139_v28 }
  0xe8   :  { %v443_v31 = vpop.f32.mrf.mxu0 }
  0xe9   :  { %461 = vmatmul.mubr.bf16.vlgmr.msra.gmra.mxu1 %v140_v30 }
 0x1a9   :  { %v246_v35 = vpop.f32.mrf.mxu1 }
 0x1aa   :  { %v247_v36 = vadd.f32 %v379_v34, %v246_v35 }
 0x1ab   :  { %v462_v37 = vpop.f32.mrf.mxu1 }
 0x1ac   :  { %v252_v38 = vmax.f32 %v247_v36, 0.0 }
 0x1ad   :  { %v249_v39 = vpop.f32.mrf.mxu1 }
 0x1ae   :  { %v253_v40 = vpack.c.bf16 %v252_v38, %v252_v38 }
 0x1af   :  { %v463_v41 = vpop.f32.mrf.mxu1 }
 0x1b0   :  { %481 = vmatmul.mubr.bf16.vlgmr.msra.gmra.mxu0 %v253_v40 }
 0x270   :  { %v359_v43 = vpop.f32.mrf.mxu0 }
 0x271   :  { %v360_v44 = vadd.f32 %v388_v42, %v359_v43 }
 0x272   :  { %v482_v45 = vpop.f32.mrf.mxu0 }
 0x273   :  { %365 = vst [vmem:[%s676_s7] sm:$0xff] %v360_v44 }
 0x274   :  { %v362_v46 = vpop.f32.mrf.mxu0 }
 0x276   :  { %v483_v47 = vpop.f32.mrf.mxu0 }

</bundles_post_ra>
